<compile_context>
chip_gen: v7x
topology: tpu7x:2x2x1
jax: 0.10.0
libtpu: 0.0.40
codegen_flags: <defaults>
</compile_context>

<pallas_src>
import functools

import jax
import jax.numpy as jnp
from jax.experimental import pallas as pl
from jax.experimental.pallas import tpu as pltpu


def _round_up(x, m):
    return -(-x // m) * m


# --------------------------------------------------------------------------
# Fused conv + folded-BN + LeakyReLU kernel: one cout tile per grid step.
# --------------------------------------------------------------------------
def _darkconv_kernel(x_ref, w_ref, s_ref, b_ref, o_ref, *scratch,
                     taps, cis, mq, slope):
    """x_ref : (cis, L_in)  bf16  channels-first, s2d'd, flattened activation
       w_ref : (tn, Kfull)  bf16  weight tile, Kfull = len(taps)*cis
       s_ref : (tn, 1)      f32   folded BN scale
       b_ref : (tn, 1)      f32   folded BN bias
       o_ref : (tn, mq)     f32   wide output tile (garbage cols sliced later)
       scratch[0] (only if kq>1): (Kfull, mq) bf16 im2col slab."""
    if len(taps) > 1:
        slab = scratch[0]
        for t, off in enumerate(taps):
            # contiguous window of the flat strip -> K rows [t*cis, (t+1)*cis)
            slab[pl.ds(t * cis, cis), :] = x_ref[:, pl.ds(off, mq)]
        rhs = slab[...]
    else:  # 1x1 conv: the strip itself is the im2col slab
        rhs = x_ref[:, pl.ds(0, mq)]

    # single MXU matmul, f32 accumulation
    acc = jnp.dot(w_ref[...], rhs, preferred_element_type=jnp.float32)

    # folded BatchNorm (eval) + LeakyReLU epilogue in f32
    y = acc * s_ref[...] + b_ref[...]
    o_ref[...] = jnp.where(y > 0, y, jnp.float32(slope) * y)


def _fold_bn(gamma, beta, rmean, rvar, eps=1e-5):
    inv = 1.0 / jnp.sqrt(rvar + eps)
    scale = gamma * inv
    bias = beta - rmean * gamma * inv
    return scale, bias


# --------------------------------------------------------------------------
# Wrapper: NCHW in/out, all glue + one pallas_call under a single jit.
# --------------------------------------------------------------------------
@functools.partial(jax.jit, static_argnames=("k", "s", "p"))
def darkconv_forward(x_nchw, w, gamma, beta, rmean, rvar, *, k, s, p):
    """DarkConv forward: LeakyReLU(BN_eval(Conv2d(x, w, stride=s, pad=p)))."""
    N, cin, H, W = x_nchw.shape
    cout = w.shape[0]

    Ho = (H + 2 * p - k) // s + 1
    Wo = (W + 2 * p - k) // s + 1
    kq = (k - 1) // s + 1                      # taps per axis after s2d

    Hp = _round_up(H + 2 * p, s)
    Wp = _round_up(W + 2 * p, s)
    Hs, Ws = Hp // s, Wp // s
    cis = s * s * cin                          # channels after space-to-depth

    # every window the kernel slices must stay inside the feature map
    assert Hs >= Ho + kq - 1 and Ws >= Wo + kq - 1, (Hs, Ws, Ho, Wo, kq)

    # --- activation: pad -> space-to-depth -> channels-first flat strip ----
    xp = jnp.pad(x_nchw, ((0, 0), (0, 0), (p, Hp - H - p), (p, Wp - W - p)))
    xs = xp.reshape(N, cin, Hs, s, Ws, s)
    xs = xs.transpose(3, 5, 1, 0, 2, 4)        # (ry, rx, c, n, ys, xs)
    xflat = xs.reshape(cis, N * Hs * Ws)

    M = N * Hs * Ws                            # "wide" output positions
    Mq = _round_up(M, 128)                     # lane-padded output width
    taps = tuple(qy * Ws + qx for qy in range(kq) for qx in range(kq))
    L_in = _round_up(Mq + max(taps), 128)      # strip length incl. overrun
    assert max(taps) + Mq <= L_in
    xflat = jnp.pad(xflat, ((0, 0), (0, L_in - M))).astype(jnp.bfloat16)

    # --- weight: phase-rearrange to match the s2d channel / tap ordering ---
    kqs = kq * s
    wp = jnp.pad(w, ((0, 0), (0, 0), (0, kqs - k), (0, kqs - k)))
    wr = wp.reshape(cout, cin, kq, s, kq, s)
    wr = wr.transpose(0, 2, 4, 3, 5, 1)        # (co, qy, qx, ry, rx, c)
    kfull = kq * kq * cis
    wmat = wr.reshape(cout, kfull)

    # cout only needs sublane (8) padding thanks to the transposed output
    co_p = _round_up(cout, 8)
    if co_p > 256 and co_p % 256 == 0:
        tn = 256
    elif co_p > 128 and co_p % 128 == 0:
        tn = 128
    else:
        tn = co_p
    wmat = jnp.pad(wmat, ((0, co_p - cout), (0, 0))).astype(jnp.bfloat16)

    scale, bias = _fold_bn(gamma, beta, rmean, rvar)
    scale = jnp.pad(scale, (0, co_p - cout)).reshape(co_p, 1).astype(jnp.float32)
    bias = jnp.pad(bias, (0, co_p - cout)).reshape(co_p, 1).astype(jnp.float32)

    kern = functools.partial(_darkconv_kernel, taps=taps, cis=cis, mq=Mq,
                             slope=0.1)
    scratch = ([pltpu.VMEM((kfull, Mq), jnp.bfloat16)] if len(taps) > 1 else [])

    out = pl.pallas_call(
        kern,
        out_shape=jax.ShapeDtypeStruct((co_p, Mq), jnp.float32),
        grid_spec=pltpu.PrefetchScalarGridSpec(
            num_scalar_prefetch=0,
            grid=(co_p // tn,),
            in_specs=[
                # activation block index never changes -> stays VMEM-resident
                pl.BlockSpec((cis, L_in), lambda j: (0, 0)),
                pl.BlockSpec((tn, kfull), lambda j: (j, 0)),
                pl.BlockSpec((tn, 1), lambda j: (j, 0)),
                pl.BlockSpec((tn, 1), lambda j: (j, 0)),
            ],
            out_specs=pl.BlockSpec((tn, Mq), lambda j: (j, 0)),
            scratch_shapes=scratch),
        compiler_params=pltpu.CompilerParams(
            dimension_semantics=("parallel",),
            vmem_limit_bytes=32 * 1024 * 1024),
        cost_estimate=pl.CostEstimate(
            flops=2 * co_p * kfull * Mq,
            transcendentals=0,
            bytes_accessed=(cis * L_in + co_p * kfull) * 2 + co_p * Mq * 4),
    )(xflat, wmat, scale, bias)

    # drop pad channels, wide garbage columns and the halo rows/cols
    out = out[:cout, :M].reshape(cout, N, Hs, Ws)[:, :, :Ho, :Wo]
    return jnp.transpose(out, (1, 0, 2, 3))    # back to NCHW


# --------------------------------------------------------------------------
# Pure-JAX reference (same bf16 operand quantization, eval-mode BN fold).
# --------------------------------------------------------------------------
def darkconv_reference(x_nchw, w, gamma, beta, rmean, rvar, *, k, s, p):
    xq = x_nchw.astype(jnp.bfloat16).astype(jnp.float32)
    wq = w.astype(jnp.bfloat16).astype(jnp.float32)
    y = jax.lax.conv_general_dilated(
        xq, wq, window_strides=(s, s), padding=[(p, p), (p, p)],
        dimension_numbers=("NCHW", "OIHW", "NCHW"))
    scale, bias = _fold_bn(gamma, beta, rmean, rvar)
    y = y * scale[None, :, None, None] + bias[None, :, None, None]
    return jnp.where(y > 0, y, 0.1 * y)


# --------------------------------------------------------------------------
if __name__ == "__main__":
    batch = 2
    configs = [  # (cin, cout, k, s, p, H, W) — the DarkConv shapes YOLO uses
        dict(cin=16, cout=32, k=3, s=1, p=1, H=16, W=16),
        dict(cin=16, cout=32, k=3, s=2, p=1, H=16, W=16),
        dict(cin=32, cout=64, k=1, s=1, p=0, H=8, W=8),
    ]

    key = jax.random.PRNGKey(0)
    for cfg in configs:
        key, kx, kw, kg = jax.random.split(key, 4)
        x = jax.random.normal(kx, (batch, cfg["cin"], cfg["H"], cfg["W"]),
                              jnp.float32)
        # matches the PyTorch init: Conv ~ N(0, 0.02), BN gamma ~ N(1, 0.02)
        w = 0.02 * jax.random.normal(
            kw, (cfg["cout"], cfg["cin"], cfg["k"], cfg["k"]), jnp.float32)
        gamma = 1.0 + 0.02 * jax.random.normal(kg, (cfg["cout"],), jnp.float32)
        beta = jnp.zeros((cfg["cout"],), jnp.float32)
        rmean = jnp.zeros((cfg["cout"],), jnp.float32)
        rvar = jnp.ones((cfg["cout"],), jnp.float32)

        out = darkconv_forward(x, w, gamma, beta, rmean, rvar,
                               k=cfg["k"], s=cfg["s"], p=cfg["p"])
        out = jax.block_until_ready(out)

        Ho = (cfg["H"] + 2 * cfg["p"] - cfg["k"]) // cfg["s"] + 1
        Wo = (cfg["W"] + 2 * cfg["p"] - cfg["k"]) // cfg["s"] + 1
        assert out.shape == (batch, cfg["cout"], Ho, Wo), (out.shape, cfg)
        assert out.dtype == jnp.float32

        ref = darkconv_reference(x, w, gamma, beta, rmean, rvar,
                                 k=cfg["k"], s=cfg["s"], p=cfg["p"])
        err = float(jnp.max(jnp.abs(out - ref)))
        assert err < 1e-2, (cfg, err)

    print("KERNEL_OK")
</pallas_src>

<mosaic_0001>
module attributes {stable_mosaic.version = 11 : i64} {
  func.func @_darkconv_kernel(%arg0: i32, %arg1: memref<16x896xbf16, #tpu.memory_space<vmem>>, %arg2: memref<32x144xbf16, #tpu.memory_space<vmem>>, %arg3: memref<32x1xf32, #tpu.memory_space<vmem>>, %arg4: memref<32x1xf32, #tpu.memory_space<vmem>>, %arg5: memref<32x768xf32, #tpu.memory_space<vmem>>, %arg6: memref<144x768xbf16, #tpu.memory_space<vmem>>) attributes {dimension_semantics = [#tpu.dimension_semantics<parallel>], iteration_bounds = array<i64: 1>, scalar_prefetch = 0 : i64, scratch_operands = 1 : i64, tpu.core_type = #tpu.core_type<tc>, window_params = [{pipeline_mode = #tpu.pipeline_mode<synchronous>, transform_indices = @transform_0, window_bounds = array<i64: 16, 896>}, {transform_indices = @transform_1, window_bounds = array<i64: 32, 144>}, {transform_indices = @transform_2, window_bounds = array<i64: 32, 1>}, {transform_indices = @transform_3, window_bounds = array<i64: 32, 1>}, {transform_indices = @transform_4, window_bounds = array<i64: 32, 768>}]} {
    %c0 = arith.constant 0 : index
    %c0_0 = arith.constant 0 : index
    %0 = vector.load %arg1[%c0, %c0_0] : memref<16x896xbf16, #tpu.memory_space<vmem>>, vector<16x768xbf16>
    %c0_1 = arith.constant 0 : index
    %c0_2 = arith.constant 0 : index
    %1 = vector.load %arg6[%c0_1, %c0_2] : memref<144x768xbf16, #tpu.memory_space<vmem>>, vector<16x768xbf16>
    tpu.vector_store %arg6[%c0_1, %c0_2], %0 {strides = array<i32>} : memref<144x768xbf16, #tpu.memory_space<vmem>>, vector<16x768xbf16>,
    %c0_3 = arith.constant 0 : index
    %c1 = arith.constant 1 : index
    %2 = vector.load %arg1[%c0_3, %c1] : memref<16x896xbf16, #tpu.memory_space<vmem>>, vector<16x768xbf16>
    %c16 = arith.constant 16 : index
    %c0_4 = arith.constant 0 : index
    %3 = vector.load %arg6[%c16, %c0_4] : memref<144x768xbf16, #tpu.memory_space<vmem>>, vector<16x768xbf16>
    tpu.vector_store %arg6[%c16, %c0_4], %2 {strides = array<i32>} : memref<144x768xbf16, #tpu.memory_space<vmem>>, vector<16x768xbf16>,
    %c0_5 = arith.constant 0 : index
    %c2 = arith.constant 2 : index
    %4 = vector.load %arg1[%c0_5, %c2] : memref<16x896xbf16, #tpu.memory_space<vmem>>, vector<16x768xbf16>
    %c32 = arith.constant 32 : index
    %c0_6 = arith.constant 0 : index
    %5 = vector.load %arg6[%c32, %c0_6] : memref<144x768xbf16, #tpu.memory_space<vmem>>, vector<16x768xbf16>
    tpu.vector_store %arg6[%c32, %c0_6], %4 {strides = array<i32>} : memref<144x768xbf16, #tpu.memory_space<vmem>>, vector<16x768xbf16>,
    %c0_7 = arith.constant 0 : index
    %c18 = arith.constant 18 : index
    %6 = vector.load %arg1[%c0_7, %c18] : memref<16x896xbf16, #tpu.memory_space<vmem>>, vector<16x768xbf16>
    %c48 = arith.constant 48 : index
    %c0_8 = arith.constant 0 : index
    %7 = vector.load %arg6[%c48, %c0_8] : memref<144x768xbf16, #tpu.memory_space<vmem>>, vector<16x768xbf16>
    tpu.vector_store %arg6[%c48, %c0_8], %6 {strides = array<i32>} : memref<144x768xbf16, #tpu.memory_space<vmem>>, vector<16x768xbf16>,
    %c0_9 = arith.constant 0 : index
    %c19 = arith.constant 19 : index
    %8 = vector.load %arg1[%c0_9, %c19] : memref<16x896xbf16, #tpu.memory_space<vmem>>, vector<16x768xbf16>
    %c64 = arith.constant 64 : index
    %c0_10 = arith.constant 0 : index
    %9 = vector.load %arg6[%c64, %c0_10] : memref<144x768xbf16, #tpu.memory_space<vmem>>, vector<16x768xbf16>
    tpu.vector_store %arg6[%c64, %c0_10], %8 {strides = array<i32>} : memref<144x768xbf16, #tpu.memory_space<vmem>>, vector<16x768xbf16>,
    %c0_11 = arith.constant 0 : index
    %c20 = arith.constant 20 : index
    %10 = vector.load %arg1[%c0_11, %c20] : memref<16x896xbf16, #tpu.memory_space<vmem>>, vector<16x768xbf16>
    %c80 = arith.constant 80 : index
    %c0_12 = arith.constant 0 : index
    %11 = vector.load %arg6[%c80, %c0_12] : memref<144x768xbf16, #tpu.memory_space<vmem>>, vector<16x768xbf16>
    tpu.vector_store %arg6[%c80, %c0_12], %10 {strides = array<i32>} : memref<144x768xbf16, #tpu.memory_space<vmem>>, vector<16x768xbf16>,
    %c0_13 = arith.constant 0 : index
    %c36 = arith.constant 36 : index
    %12 = vector.load %arg1[%c0_13, %c36] : memref<16x896xbf16, #tpu.memory_space<vmem>>, vector<16x768xbf16>
    %c96 = arith.constant 96 : index
    %c0_14 = arith.constant 0 : index
    %13 = vector.load %arg6[%c96, %c0_14] : memref<144x768xbf16, #tpu.memory_space<vmem>>, vector<16x768xbf16>
    tpu.vector_store %arg6[%c96, %c0_14], %12 {strides = array<i32>} : memref<144x768xbf16, #tpu.memory_space<vmem>>, vector<16x768xbf16>,
    %c0_15 = arith.constant 0 : index
    %c37 = arith.constant 37 : index
    %14 = vector.load %arg1[%c0_15, %c37] : memref<16x896xbf16, #tpu.memory_space<vmem>>, vector<16x768xbf16>
    %c112 = arith.constant 112 : index
    %c0_16 = arith.constant 0 : index
    %15 = vector.load %arg6[%c112, %c0_16] : memref<144x768xbf16, #tpu.memory_space<vmem>>, vector<16x768xbf16>
    tpu.vector_store %arg6[%c112, %c0_16], %14 {strides = array<i32>} : memref<144x768xbf16, #tpu.memory_space<vmem>>, vector<16x768xbf16>,
    %c0_17 = arith.constant 0 : index
    %c38 = arith.constant 38 : index
    %16 = vector.load %arg1[%c0_17, %c38] : memref<16x896xbf16, #tpu.memory_space<vmem>>, vector<16x768xbf16>
    %c128 = arith.constant 128 : index
    %c0_18 = arith.constant 0 : index
    %17 = vector.load %arg6[%c128, %c0_18] : memref<144x768xbf16, #tpu.memory_space<vmem>>, vector<16x768xbf16>
    tpu.vector_store %arg6[%c128, %c0_18], %16 {strides = array<i32>} : memref<144x768xbf16, #tpu.memory_space<vmem>>, vector<16x768xbf16>,
    %c0_19 = arith.constant 0 : index
    %c0_20 = arith.constant 0 : index
    %18 = vector.load %arg6[%c0_19, %c0_20] : memref<144x768xbf16, #tpu.memory_space<vmem>>, vector<144x768xbf16>
    %c0_21 = arith.constant 0 : index
    %c0_22 = arith.constant 0 : index
    %19 = vector.load %arg2[%c0_21, %c0_22] : memref<32x144xbf16, #tpu.memory_space<vmem>>, vector<32x144xbf16>
    %cst = arith.constant dense<0.000000e+00> : vector<32x768xf32>
    %20 = tpu.matmul %19, %18, %cst {dimension_numbers = #tpu.dot_dimension_numbers<[1], [0], [0], [1], [0, 0, 1, 1], [], []>} : vector<32x144xbf16>, vector<144x768xbf16>, vector<32x768xf32> -> vector<32x768xf32>
    %c0_23 = arith.constant 0 : index
    %c0_24 = arith.constant 0 : index
    %21 = vector.load %arg3[%c0_23, %c0_24] : memref<32x1xf32, #tpu.memory_space<vmem>>, vector<32x1xf32>
    %22 = vector.broadcast %21 : vector<32x1xf32> to vector<32x768xf32>
    %23 = arith.mulf %20, %22 : vector<32x768xf32>
    %c0_25 = arith.constant 0 : index
    %c0_26 = arith.constant 0 : index
    %24 = vector.load %arg4[%c0_25, %c0_26] : memref<32x1xf32, #tpu.memory_space<vmem>>, vector<32x1xf32>
    %25 = vector.broadcast %24 : vector<32x1xf32> to vector<32x768xf32>
    %26 = arith.addf %23, %25 : vector<32x768xf32>
    %cst_27 = arith.constant 0.000000e+00 : f32
    %27 = vector.broadcast %cst_27 : f32 to vector<32x768xf32>
    %28 = arith.cmpf ogt, %26, %27 : vector<32x768xf32>
    %cst_28 = arith.constant 1.000000e-01 : f32
    %29 = vector.broadcast %cst_28 : f32 to vector<32x768xf32>
    %30 = arith.mulf %29, %26 : vector<32x768xf32>
    %31 = arith.select %28, %26, %30 : vector<32x768xi1>, vector<32x768xf32>
    %c0_29 = arith.constant 0 : index
    %c0_30 = arith.constant 0 : index
    %32 = vector.load %arg5[%c0_29, %c0_30] : memref<32x768xf32, #tpu.memory_space<vmem>>, vector<32x768xf32>
    tpu.vector_store %arg5[%c0_29, %c0_30], %31 {strides = array<i32>} : memref<32x768xf32, #tpu.memory_space<vmem>>, vector<32x768xf32>,
    return
  }
  func.func @transform_0(%arg0: i32) -> (i32, i32) {
    %c0_i32 = arith.constant 0 : i32
    %c0_i32_0 = arith.constant 0 : i32
    %c0_i32_1 = arith.constant 0 : i32
    return %c0_i32, %c0_i32_0 : i32, i32
  }
  func.func @transform_1(%arg0: i32) -> (i32, i32) {
    %c0_i32 = arith.constant 0 : i32
    %c0_i32_0 = arith.constant 0 : i32
    return %arg0, %c0_i32 : i32, i32
  }
  func.func @transform_2(%arg0: i32) -> (i32, i32) {
    %c0_i32 = arith.constant 0 : i32
    %c0_i32_0 = arith.constant 0 : i32
    return %arg0, %c0_i32 : i32, i32
  }
  func.func @transform_3(%arg0: i32) -> (i32, i32) {
    %c0_i32 = arith.constant 0 : i32
    %c0_i32_0 = arith.constant 0 : i32
    return %arg0, %c0_i32 : i32, i32
  }
  func.func @transform_4(%arg0: i32) -> (i32, i32) {
    %c0_i32 = arith.constant 0 : i32
    %c0_i32_0 = arith.constant 0 : i32
    return %arg0, %c0_i32 : i32, i32
  }
}

</mosaic_0001>

<bundles_post_ra>
// kernel: darkconv_forward.1
= control target key start
LH: loop header
LB: loop body
LE: loop exit
PB: predicated region body
PF: predicated region fallthrough
CT: control target
= control target key end

     0   :  { %s1182_s19 = smov 127   ;;  %s1183_s26 = smov 126   ;;  %vm696_vm0 = vcmask 130048   ;;  %v1190_v15 = vmov 0   ;;  %vm111_vm1 = vcmask 1039360   ;;  %vm181_vm2 = vcmask 1031168   ;;  %s1613_s0 = inlined_call_operand.vmem [shape: bf16[16,896], index: 0, kind: input, shape index: {}]   ;;  %s1614_s1 = inlined_call_operand.vmem [shape: bf16[32,144], index: 1, kind: input, shape index: {}]   ;;  %s1615_s2 = inlined_call_operand.vmem [shape: f32[32,1], index: 2, kind: input, shape index: {}]   ;;  %s1616_s3 = inlined_call_operand.vmem [shape: f32[32,1], index: 3, kind: input, shape index: {}]   ;;  %s1617_s4 = inlined_call_operand.vmem [shape: f32[32,768], index: 4, kind: output, shape index: {}]  }
   0x1   :  { %v1159_v0 = vld [vmem:[%s1613_s0 + $0xc] ss:$28 sps:$4 sm:$0xff]   ;;  %v1162_v2 = vld [vmem:[%s1613_s0 + $0x4] ss:$28 sps:$4 sm:$0xff]   ;;  %s1184_s27 = smov 110   ;;  %s1185_s28 = smov 109   ;;  %1158 = vset.pattern.permute.xlu1 %v1190_v15  ;;  %1157 = vset.pattern.permute.xlu0 %v1190_v15 }
   0x2   :  { %v1161_v1 = vld [vmem:[%s1613_s0 + $0x8] ss:$28 sps:$4 sm:$0xff]   ;;  %103 = vrot.lane.b32.xlu1 %v1159_v0, %s1182_s19  ;;  %756 = vmatprep.subr.bf16.mxu1 %v1159_v0  ;;  %v1164_v3 = vld [vmem:[%s1613_s0] ss:$28 sps:$4 sm:$0xff]   ;;  %v1232_v4 = vld [vmem:[%s1613_s0 + $0x10] ss:$28 sps:$4 sm:$0xff]  }
   0x3   :  { %757 = vmatpush1.bf16.msra.mxu1 %v1161_v1  ;;  %99 = vrot.lane.b32.xlu0 %v1162_v2, %s1182_s19  ;;  %s1186_s29 = smov 108   ;;  %s1187_s30 = smov 92   ;;  %v1277_v5 = vld [vmem:[%s1614_s1 + $0x4] ss:$8 sps:$4 sm:$0xff]   ;;  %v1168_v6 = vld [vmem:[%s1613_s0 + $0x18] ss:$28 sps:$4 sm:$0xff]  }
   0x4   :  { %703 = vmatprep.subr.bf16.mxu0 %v1162_v2  ;;  %s1188_s5 = smov 91   ;;  %s1189_s8 = smov 90   ;;  %1124 = vmatprep.mubr.msk.bf16.mxu0 %vm696_vm0, %v1277_v5  ;;  %v1296_v7 = vld [vmem:[%s1613_s0 + $0x14] ss:$28 sps:$4 sm:$0xff]   ;;  %v863_v16 = vld [vmem:[%s1615_s2 + $0x8] sm:$0xff]  ;;  %v862_v17 = vld [vmem:[%s1615_s2] sm:$0xff] }
   0x5   :  { %704 = vmatpush1.bf16.msra.mxu0 %v1164_v3  ;;  %1126 = vmatprep.mubr.msk.bf16.mxu1 %vm696_vm0, %v1277_v5  ;;  %v1169_v8 = vld [vmem:[%s1613_s0 + $0x18] ss:$28 sps:$4 sm:$0xff]   ;;  %v910_v22 = vld [vmem:[%s1616_s3] sm:$0xff]  ;;  %v911_v26 = vld [vmem:[%s1616_s3 + $0x8] sm:$0xff]  ;;  %vm251_vm3 = vcmask 900096   ;;  %vm321_vm4 = vcmask 891904  }
   0x6   :  { %105 = vrot.lane.b32.xlu1 %v1232_v4, %s1182_s19  ;;  %v1170_v9 = vld [vmem:[%s1613_s0 + $0x18] ss:$28 sps:$4 sm:$0xff]   ;;  %vm391_vm5 = vcmask 883712   ;;  %vm461_vm6 = vcmask 752640   ;;  %vm531_vm7 = vcmask 744448   ;;  %vm601_vm8 = vcmask 736256  }
   0x7   :  { %101 = vrot.lane.b32.xlu0 %v1161_v1, %s1182_s19  ;;  %v1171_v10 = vld [vmem:[%s1613_s0 + $0x18] ss:$28 sps:$4 sm:$0xff]  }
   0x8   :  { %v1172_v11 = vld [vmem:[%s1613_s0 + $0x18] ss:$28 sps:$4 sm:$0xff]  }
   0x9   :  { %v1173_v12 = vld [vmem:[%s1613_s0 + $0x18] ss:$28 sps:$4 sm:$0xff]  }
   0xa   :  { %169 = vrot.lane.b32.xlu1 %v1162_v2, %s1183_s26  ;;  %v1174_v13 = vld [vmem:[%s1613_s0 + $0x18] ss:$28 sps:$4 sm:$0xff]  }
   0xb   :  { %97 = vrot.lane.b32.xlu0 %v1164_v3, %s1182_s19  ;;  %v1175_v14 = vld [vmem:[%s1613_s0 + $0x18] ss:$28 sps:$4 sm:$0xff]  }
   0xc   :  { %v864_v18 = vld [vmem:[%s1615_s2 + $0x10] sm:$0xff]  ;;  %v865_v20 = vld [vmem:[%s1615_s2 + $0x18] sm:$0xff] }
   0xd   :  { %v912_v29 = vld [vmem:[%s1616_s3 + $0x10] sm:$0xff]  ;;  %v913_v32 = vld [vmem:[%s1616_s3 + $0x18] sm:$0xff] }
   0xe   :  { %173 = vrot.lane.b32.xlu1 %v1159_v0, %s1183_s26 }
   0xf   :  { %171 = vrot.lane.b32.xlu0 %v1161_v1, %s1183_s26 }
  0x12   :  { %167 = vrot.lane.b32.xlu1 %v1164_v3, %s1183_s26 }
  0x13   :  { %175 = vrot.lane.b32.xlu0 %v1232_v4, %s1183_s26 }
  0x16   :  { %241 = vrot.lane.b32.xlu1 %v1161_v1, %s1184_s27 }
  0x17   :  { %239 = vrot.lane.b32.xlu0 %v1162_v2, %s1184_s27 }
  0x1a   :  { %245 = vrot.lane.b32.xlu1 %v1232_v4, %s1184_s27 }
  0x1b   :  { %243 = vrot.lane.b32.xlu0 %v1159_v0, %s1184_s27 }
  0x1e   :  { %309 = vrot.lane.b32.xlu1 %v1162_v2, %s1185_s28 }
  0x1f   :  { %237 = vrot.lane.b32.xlu0 %v1164_v3, %s1184_s27 }
  0x22   :  { %313 = vrot.lane.b32.xlu1 %v1159_v0, %s1185_s28 }
  0x23   :  { %311 = vrot.lane.b32.xlu0 %v1161_v1, %s1185_s28 }
  0x26   :  { %307 = vrot.lane.b32.xlu1 %v1164_v3, %s1185_s28 }
  0x27   :  { %315 = vrot.lane.b32.xlu0 %v1232_v4, %s1185_s28 }
  0x2a   :  { %381 = vrot.lane.b32.xlu1 %v1161_v1, %s1186_s29 }
  0x2b   :  { %379 = vrot.lane.b32.xlu0 %v1162_v2, %s1186_s29 }
  0x2e   :  { %385 = vrot.lane.b32.xlu1 %v1232_v4, %s1186_s29 }
  0x2f   :  { %383 = vrot.lane.b32.xlu0 %v1159_v0, %s1186_s29 }
  0x32   :  { %449 = vrot.lane.b32.xlu1 %v1162_v2, %s1187_s30 }
  0x33   :  { %377 = vrot.lane.b32.xlu0 %v1164_v3, %s1186_s29 }
  0x36   :  { %453 = vrot.lane.b32.xlu1 %v1159_v0, %s1187_s30 }
  0x37   :  { %451 = vrot.lane.b32.xlu0 %v1161_v1, %s1187_s30 }
  0x3a   :  { %447 = vrot.lane.b32.xlu1 %v1164_v3, %s1187_s30 }
  0x3b   :  { %455 = vrot.lane.b32.xlu0 %v1232_v4, %s1187_s30 }
  0x3e   :  { %521 = vrot.lane.b32.xlu1 %v1161_v1, %s1188_s5 }
  0x3f   :  { %519 = vrot.lane.b32.xlu0 %v1162_v2, %s1188_s5 }
  0x42   :  { %525 = vrot.lane.b32.xlu1 %v1232_v4, %s1188_s5 }
  0x43   :  { %523 = vrot.lane.b32.xlu0 %v1159_v0, %s1188_s5 }
  0x46   :  { %589 = vrot.lane.b32.xlu1 %v1162_v2, %s1189_s8 }
  0x47   :  { %517 = vrot.lane.b32.xlu0 %v1164_v3, %s1188_s5 }
  0x4a   :  { %593 = vrot.lane.b32.xlu1 %v1159_v0, %s1189_s8 }
  0x4b   :  { %591 = vrot.lane.b32.xlu0 %v1161_v1, %s1189_s8 }
  0x4e   :  { %587 = vrot.lane.b32.xlu1 %v1164_v3, %s1189_s8 }
  0x4f   :  { %595 = vrot.lane.b32.xlu0 %v1232_v4, %s1189_s8 }
  0x52   :  { %109 = vrot.lane.b32.xlu1 %v1168_v6, %s1182_s19 }
  0x53   :  { %107 = vrot.lane.b32.xlu0 %v1296_v7, %s1182_s19 }
  0x56   :  { %179 = vrot.lane.b32.xlu1 %v1169_v8, %s1183_s26 }
  0x57   :  { %177 = vrot.lane.b32.xlu0 %v1296_v7, %s1183_s26 }
  0x5a   :  { %249 = vrot.lane.b32.xlu1 %v1170_v9, %s1184_s27 }
  0x5b   :  { %247 = vrot.lane.b32.xlu0 %v1296_v7, %s1184_s27 }
  0x5e   :  { %319 = vrot.lane.b32.xlu1 %v1171_v10, %s1185_s28 }
  0x5f   :  { %317 = vrot.lane.b32.xlu0 %v1296_v7, %s1185_s28 }
  0x62   :  { %389 = vrot.lane.b32.xlu1 %v1172_v11, %s1186_s29 }
  0x63   :  { %387 = vrot.lane.b32.xlu0 %v1296_v7, %s1186_s29 }
  0x66   :  { %459 = vrot.lane.b32.xlu1 %v1173_v12, %s1187_s30 }
  0x67   :  { %457 = vrot.lane.b32.xlu0 %v1296_v7, %s1187_s30 }
  0x6a   :  { %529 = vrot.lane.b32.xlu1 %v1174_v13, %s1188_s5 }
  0x6b   :  { %527 = vrot.lane.b32.xlu0 %v1296_v7, %s1188_s5 }
  0x6e   :  { %599 = vrot.lane.b32.xlu1 %v1175_v14, %s1189_s8 }
  0x6f   :  { %597 = vrot.lane.b32.xlu0 %v1296_v7, %s1189_s8 }
  0x72   :  { %873 = vperm.xlu1 %1158, %v863_v16  }
  0x73   :  { %868 = vperm.xlu0 %1157, %v862_v17  }
  0x74   :  { %v104_v19 = vpop.permute.xlu1 %103 }
  0x75   :  { %v100_v21 = vpop.permute.xlu0 %99 }
  0x76   :  { %878 = vperm.xlu1 %1158, %v864_v18  }
  0x77   :  { %883 = vperm.xlu0 %1157, %v865_v20  }
  0x78   :  { %v1358_v23 = vpop.permute.xlu1 %105 }
  0x79   :  { %v115_v24 = vsel %vm111_vm1, %v104_v19, %v1358_v23  ;;  %v102_v25 = vpop.permute.xlu0 %101 }
  0x7a   :  { %758 = vmatprep.subr.bf16.mxu1 %v115_v24  ;;  %916 = vperm.xlu1 %1158, %v910_v22   ;;  %v113_v27 = vsel %vm111_vm1, %v100_v21, %v102_v25  ;;  %v114_v28 = vsel %vm111_vm1, %v102_v25, %v104_v19 }
  0x7b   :  { %705 = vmatprep.subr.bf16.mxu0 %v113_v27  ;;  %759 = vmatpush1.bf16.msra.mxu1 %v114_v28 }
  0x7c   :  { %v170_v30 = vpop.permute.xlu1 %169  ;;  %921 = vperm.xlu0 %1157, %v911_v26  }
  0x7d   :  { %v98_v31 = vpop.permute.xlu0 %97 }
  0x7e   :  { %926 = vperm.xlu1 %1158, %v912_v29   ;;  %v112_v33 = vsel %vm111_vm1, %v98_v31, %v100_v21 }
  0x7f   :  { %706 = vmatpush1.bf16.msra.mxu0 %v112_v33  ;;  %v1421_v33 = vld [vmem:[%s1614_s1] ss:$8 sps:$4 sm:$0xff]  }
  0x80   :  { %v174_v34 = vpop.permute.xlu1 %173  ;;  %931 = vperm.xlu0 %1157, %v913_v32  }
  0x81   :  { %v172_v35 = vpop.permute.xlu0 %171 }
  0x82   :  { %v183_v36 = vsel %vm181_vm2, %v170_v30, %v172_v35  ;;  %v184_v41 = vsel %vm181_vm2, %v172_v35, %v174_v34 }
  0x83   :  { %707 = vmatprep.subr.bf16.mxu0 %v183_v36  ;;  %v1179_v36 = vld [vmem:[%s1614_s1 + $0x14] ss:$8 sps:$4 sm:$0xff]  }
  0x84   :  { %v168_v37 = vpop.permute.xlu1 %167 }
  0x85   :  { %v182_v38 = vsel %vm181_vm2, %v168_v37, %v170_v30  ;;  %v1376_v39 = vpop.permute.xlu0 %175 }
  0x86   :  { %708 = vmatpush1.bf16.msra.mxu0 %v182_v38  ;;  %v185_v40 = vsel %vm181_vm2, %v174_v34, %v1376_v39 }
  0x87   :  { %760 = vmatprep.subr.bf16.mxu1 %v185_v40 }
  0x88   :  { %v242_v42 = vpop.permute.xlu1 %241  ;;  %761 = vmatpush1.bf16.msra.mxu1 %v184_v41 }
  0x89   :  { %v240_v43 = vpop.permute.xlu0 %239 }
  0x8a   :  { %v253_v44 = vsel %vm251_vm3, %v240_v43, %v242_v42 }
  0x8b   :  { %709 = vmatprep.subr.bf16.mxu0 %v253_v44 }
  0x8c   :  { %v1382_v45 = vpop.permute.xlu1 %245 }
  0x8d   :  { %v244_v46 = vpop.permute.xlu0 %243 }
  0x8e   :  { %v255_v47 = vsel %vm251_vm3, %v244_v46, %v1382_v45  ;;  %v254_v48 = vsel %vm251_vm3, %v242_v42, %v244_v46 }
  0x8f   :  { %762 = vmatprep.subr.bf16.mxu1 %v255_v47 }
  0x90   :  { %v310_v49 = vpop.permute.xlu1 %309  ;;  %763 = vmatpush1.bf16.msra.mxu1 %v254_v48 }
  0x91   :  { %v238_v50 = vpop.permute.xlu0 %237 }
  0x92   :  { %v252_v51 = vsel %vm251_vm3, %v238_v50, %v240_v43 }
  0x93   :  { %710 = vmatpush1.bf16.msra.mxu0 %v252_v51 }
  0x94   :  { %v314_v52 = vpop.permute.xlu1 %313 }
  0x95   :  { %v312_v53 = vpop.permute.xlu0 %311 }
  0x96   :  { %v323_v54 = vsel %vm321_vm4, %v310_v49, %v312_v53  ;;  %v324_v59 = vsel %vm321_vm4, %v312_v53, %v314_v52 }
  0x97   :  { %711 = vmatprep.subr.bf16.mxu0 %v323_v54 }
  0x98   :  { %v308_v55 = vpop.permute.xlu1 %307 }
  0x99   :  { %v322_v56 = vsel %vm321_vm4, %v308_v55, %v310_v49  ;;  %v1390_v57 = vpop.permute.xlu0 %315 }
  0x9a   :  { %712 = vmatpush1.bf16.msra.mxu0 %v322_v56  ;;  %v325_v58 = vsel %vm321_vm4, %v314_v52, %v1390_v57 }
  0x9b   :  { %764 = vmatprep.subr.bf16.mxu1 %v325_v58 }
  0x9c   :  { %v382_v60 = vpop.permute.xlu1 %381  ;;  %765 = vmatpush1.bf16.msra.mxu1 %v324_v59 }
  0x9d   :  { %v380_v61 = vpop.permute.xlu0 %379 }
  0x9e   :  { %v393_v62 = vsel %vm391_vm5, %v380_v61, %v382_v60 }
  0x9f   :  { %713 = vmatprep.subr.bf16.mxu0 %v393_v62 }
  0xa0   :  { %v1396_v63 = vpop.permute.xlu1 %385 }
  0xa1   :  { %v384_v0 = vpop.permute.xlu0 %383 }
  0xa2   :  { %v395_v1 = vsel %vm391_vm5, %v384_v0, %v1396_v63  ;;  %v394_v2 = vsel %vm391_vm5, %v382_v60, %v384_v0 }
  0xa3   :  { %766 = vmatprep.subr.bf16.mxu1 %v395_v1 }
  0xa4   :  { %v450_v3 = vpop.permute.xlu1 %449  ;;  %767 = vmatpush1.bf16.msra.mxu1 %v394_v2 }
  0xa5   :  { %v378_v6 = vpop.permute.xlu0 %377 }
  0xa6   :  { %v392_v8 = vsel %vm391_vm5, %v378_v6, %v380_v61 }
  0xa7   :  { %714 = vmatpush1.bf16.msra.mxu0 %v392_v8 }
  0xa8   :  { %v454_v9 = vpop.permute.xlu1 %453 }
  0xa9   :  { %v452_v10 = vpop.permute.xlu0 %451 }
  0xaa   :  { %v463_v11 = vsel %vm461_vm6, %v450_v3, %v452_v10  ;;  %v464_v16 = vsel %vm461_vm6, %v452_v10, %v454_v9 }
  0xab   :  { %715 = vmatprep.subr.bf16.mxu0 %v463_v11 }
  0xac   :  { %v448_v12 = vpop.permute.xlu1 %447 }
  0xad   :  { %v462_v13 = vsel %vm461_vm6, %v448_v12, %v450_v3  ;;  %v1404_v14 = vpop.permute.xlu0 %455 }
  0xae   :  { %716 = vmatpush1.bf16.msra.mxu0 %v462_v13  ;;  %v465_v15 = vsel %vm461_vm6, %v454_v9, %v1404_v14 }
  0xaf   :  { %768 = vmatprep.subr.bf16.mxu1 %v465_v15 }
  0xb0   :  { %v522_v17 = vpop.permute.xlu1 %521  ;;  %769 = vmatpush1.bf16.msra.mxu1 %v464_v16 }
  0xb1   :  { %v520_v18 = vpop.permute.xlu0 %519 }
  0xb2   :  { %v533_v19 = vsel %vm531_vm7, %v520_v18, %v522_v17 }
  0xb3   :  { %717 = vmatprep.subr.bf16.mxu0 %v533_v19 }
  0xb4   :  { %v1410_v20 = vpop.permute.xlu1 %525 }
  0xb5   :  { %v524_v21 = vpop.permute.xlu0 %523 }
  0xb6   :  { %v535_v22 = vsel %vm531_vm7, %v524_v21, %v1410_v20  ;;  %v534_v24 = vsel %vm531_vm7, %v522_v17, %v524_v21 }
  0xb7   :  { %770 = vmatprep.subr.bf16.mxu1 %v535_v22 }
  0xb8   :  { %v590_v25 = vpop.permute.xlu1 %589  ;;  %771 = vmatpush1.bf16.msra.mxu1 %v534_v24 }
  0xb9   :  { %v518_v26 = vpop.permute.xlu0 %517 }
  0xba   :  { %v532_v27 = vsel %vm531_vm7, %v518_v26, %v520_v18 }
  0xbb   :  { %718 = vmatpush1.bf16.msra.mxu0 %v532_v27 }
  0xbc   :  { %v594_v28 = vpop.permute.xlu1 %593 }
  0xbd   :  { %v592_v29 = vpop.permute.xlu0 %591 }
  0xbe   :  { %v603_v30 = vsel %vm601_vm8, %v590_v25, %v592_v29  ;;  %v604_v37 = vsel %vm601_vm8, %v592_v29, %v594_v28 }
  0xbf   :  { %719 = vmatprep.subr.bf16.mxu0 %v603_v30 }
  0xc0   :  { %v588_v31 = vpop.permute.xlu1 %587 }
  0xc1   :  { %v602_v32 = vsel %vm601_vm8, %v588_v31, %v590_v25  ;;  %v1423_v34 = vpop.permute.xlu0 %595 }
  0xc2   :  { %720 = vmatpush1.bf16.msra.mxu0 %v602_v32  ;;  %v605_v35 = vsel %vm601_vm8, %v594_v28, %v1423_v34 }
  0xc3   :  { %809 = vmatprep.subr.bf16.mxu0 %v1296_v7  ;;  %772 = vmatprep.subr.bf16.mxu1 %v605_v35 }
  0xc4   :  { %v110_v38 = vpop.permute.xlu1 %109  ;;  %773 = vmatpush1.bf16.msra.mxu1 %v604_v37 }
  0xc5   :  { %736 = vmatmul.mubr.bf16.vlgmr.msra.gmra.mrb[0].mxu0 %v1421_v33  ;;  %v108_v40 = vpop.permute.xlu0 %107  ;;  %1130 = vmatprep.subr.bf16.mxu1 %v1296_v7  ;;  %v1445_v7 = vld [vmem:[%s1614_s1 + $0x10] ss:$8 sps:$4 sm:$0xff]  }
  0xc6   :  { %810 = vmatpush1.bf16.msra.mxu0 %v1232_v4  ;;  %v117_v41 = vsel %vm111_vm1, %v108_v40, %v110_v38  ;;  %1125 = vmatprep.mubr.msk.bf16.mxu0 %vm696_vm0, %v1179_v36  ;;  %v116_v43 = vsel %vm111_vm1, %v1358_v23, %v108_v40 }
  0xc7   :  { %789 = vmatmul.mubr.bf16.vlgmr.msra.gmra.mrb[0].mxu1 %v1421_v33  ;;  %811 = vmatprep.subr.bf16.mxu0 %v117_v41 }
  0xc8   :  { %v180_v42 = vpop.permute.xlu1 %179  ;;  %1139 = vmatpush1.bf16.msra.mxu1 %v1232_v4  ;;  %1127 = vmatprep.mubr.msk.bf16.mxu1 %vm696_vm0, %v1179_v36 }
  0xc9   :  { %v178_v44 = vpop.permute.xlu0 %177  ;;  %1131 = vmatprep.subr.bf16.mxu1 %v117_v41 }
  0xca   :  { %812 = vmatpush1.bf16.msra.mxu0 %v116_v43  ;;  %v187_v46 = vsel %vm181_vm2, %v178_v44, %v180_v42  ;;  %v186_v48 = vsel %vm181_vm2, %v1376_v39, %v178_v44 }
  0xcb   :  { %813 = vmatprep.subr.bf16.mxu0 %v187_v46 }
  0xcc   :  { %v250_v47 = vpop.permute.xlu1 %249  ;;  %1140 = vmatpush1.bf16.msra.mxu1 %v116_v43 }
  0xcd   :  { %746 = vmatmul.mubr.bf16.gmra.mrb[4].mxu0 %v1445_v7  ;;  %v248_v4 = vpop.permute.xlu0 %247  ;;  %1132 = vmatprep.subr.bf16.mxu1 %v187_v46 }
  0xce   :  { %814 = vmatpush1.bf16.msra.mxu0 %v186_v48  ;;  %v257_v23 = vsel %vm251_vm3, %v248_v4, %v250_v47  ;;  %1128 = vmatprep.mubr.msk.bf16.mxu0 %vm696_vm0, %v1277_v5  ;;  %v256_v50 = vsel %vm251_vm3, %v1382_v45, %v248_v4 }
  0xcf   :  { %815 = vmatprep.subr.bf16.mxu0 %v257_v23  ;;  %799 = vmatmul.mubr.bf16.gmra.mrb[4].mxu1 %v1445_v7 }
  0xd0   :  { %v320_v49 = vpop.permute.xlu1 %319  ;;  %1141 = vmatpush1.bf16.msra.mxu1 %v186_v48  ;;  %1129 = vmatprep.mubr.msk.bf16.mxu1 %vm696_vm0, %v1179_v36 }
  0xd1   :  { %v318_v39 = vpop.permute.xlu0 %317  ;;  %1133 = vmatprep.subr.bf16.mxu1 %v257_v23 }
  0xd2   :  { %816 = vmatpush1.bf16.msra.mxu0 %v256_v50  ;;  %v327_v51 = vsel %vm321_vm4, %v318_v39, %v320_v49  ;;  %v326_v5 = vsel %vm321_vm4, %v1390_v57, %v318_v39 }
  0xd3   :  { %817 = vmatprep.subr.bf16.mxu0 %v327_v51 }
  0xd4   :  { %v390_v52 = vpop.permute.xlu1 %389  ;;  %1142 = vmatpush1.bf16.msra.mxu1 %v256_v50 }
  0xd5   :  { %v388_v53 = vpop.permute.xlu0 %387  ;;  %1134 = vmatprep.subr.bf16.mxu1 %v327_v51 }
  0xd6   :  { %818 = vmatpush1.bf16.msra.mxu0 %v326_v5  ;;  %v397_v54 = vsel %vm391_vm5, %v388_v53, %v390_v52  ;;  %v396_v55 = vsel %vm391_vm5, %v1396_v63, %v388_v53 }
  0xd7   :  { %819 = vmatprep.subr.bf16.mxu0 %v397_v54 }
  0xd8   :  { %v460_v45 = vpop.permute.xlu1 %459  ;;  %1143 = vmatpush1.bf16.msra.mxu1 %v326_v5 }
  0xd9   :  { %v458_v56 = vpop.permute.xlu0 %457  ;;  %1135 = vmatprep.subr.bf16.mxu1 %v397_v54 }
  0xda   :  { %820 = vmatpush1.bf16.msra.mxu0 %v396_v55  ;;  %v467_v58 = vsel %vm461_vm6, %v458_v56, %v460_v45  ;;  %v466_v57 = vsel %vm461_vm6, %v1404_v14, %v458_v56 }
  0xdb   :  { %821 = vmatprep.subr.bf16.mxu0 %v467_v58 }
  0xdc   :  { %v530_v59 = vpop.permute.xlu1 %529  ;;  %1144 = vmatpush1.bf16.msra.mxu1 %v396_v55 }
  0xdd   :  { %v528_v60 = vpop.permute.xlu0 %527  ;;  %1136 = vmatprep.subr.bf16.mxu1 %v467_v58 }
  0xde   :  { %822 = vmatpush1.bf16.msra.mxu0 %v466_v57  ;;  %v537_v61 = vsel %vm531_vm7, %v528_v60, %v530_v59  ;;  %v536_v63 = vsel %vm531_vm7, %v1410_v20, %v528_v60 }
  0xdf   :  { %823 = vmatprep.subr.bf16.mxu0 %v537_v61 }
  0xe0   :  { %v600_v62 = vpop.permute.xlu1 %599  ;;  %1145 = vmatpush1.bf16.msra.mxu1 %v466_v57 }
  0xe1   :  { %v598_v0 = vpop.permute.xlu0 %597  ;;  %1137 = vmatprep.subr.bf16.mxu1 %v537_v61 }
  0xe2   :  { %824 = vmatpush1.bf16.msra.mxu0 %v536_v63  ;;  %v607_v1 = vsel %vm601_vm8, %v598_v0, %v600_v62  ;;  %v606_v2 = vsel %vm601_vm8, %v1423_v34, %v598_v0 }
  0xe3   :  { %825 = vmatprep.subr.bf16.mxu0 %v607_v1 }
  0xe4   :  { %1146 = vmatpush1.bf16.msra.mxu1 %v536_v63 }
  0xe5   :  { %1138 = vmatprep.subr.bf16.mxu1 %v607_v1 }
  0xe6   :  { %826 = vmatpush1.bf16.msra.mxu0 %v606_v2 }
  0xe8   :  { %1147 = vmatpush1.bf16.msra.mxu1 %v606_v2 }
  0xe9   :  { %842 = vmatmul.mubr.bf16.vlgmr.msra.gmra.mrb[8].mxu0 %v1421_v33 }
  0xeb   :  { %852 = vmatmul.mubr.bf16.vlgmr.msra.gmra.mrb[8].mxu1 %v1445_v7 }
  0xf1   :  { %v1475_v3 = vpop.permute.xlu1 %873 }
  0xf2   :  { %v1477_v6 = vpop.permute.xlu0 %868 }
  0xf5   :  { %v1479_v8 = vpop.permute.xlu1 %878 }
  0xf6   :  { %v1481_v9 = vpop.permute.xlu0 %883 }
  0xf9   :  { %v1483_v11 = vpop.permute.xlu1 %916 }
  0xfb   :  { %v1487_v16 = vpop.permute.xlu0 %921 }
  0xfd   :  { %v1507_v48 = vpop.permute.xlu1 %926 }
 0x198   :  { %v737_v10 = vpop.f32.mrb[0].mxu0 }
 0x199   :  { %v886_v12 = vmul.f32 %v1477_v6, %v737_v10  ;;  %v739_v13 = vpop.f32.mrb[1].mxu0 }
 0x19a   :  { %v887_v14 = vmul.f32 %v1477_v6, %v739_v13  ;;  %v741_v15 = vpop.f32.mrb[2].mxu0  ;;  %v790_v17 = vpop.f32.mrb[0].mxu1 }
 0x19b   :  { %v934_v18 = vadd.f32 %v1483_v11, %v886_v12  ;;  %v892_v19 = vmul.f32 %v1475_v3, %v741_v15  ;;  %v743_v20 = vpop.f32.mrb[3].mxu0  ;;  %v888_v21 = vmul.f32 %v1477_v6, %v790_v17  ;;  %v792_v24 = vpop.f32.mrb[1].mxu1 }
 0x19c   :  { %v935_v22 = vadd.f32 %v1483_v11, %v887_v14  ;;  %v893_v25 = vmul.f32 %v1475_v3, %v743_v20  ;;  %v889_v27 = vmul.f32 %v1477_v6, %v792_v24  ;;  %v794_v28 = vpop.f32.mrb[2].mxu1  ;;  %v1540_v13 = vpop.permute.xlu0 %931 }
 0x19d   :  { %vm958_vm9 = vcmp.gt.f32.partialorder %v934_v18, 0.0  ;;  %v982_v26 = vmul.f32 0.1, %v934_v18  ;;  %v940_v29 = vadd.f32 %v1487_v16, %v892_v19  ;;  %v936_v30 = vadd.f32 %v1483_v11, %v888_v21  ;;  %v796_v33 = vpop.f32.mrb[3].mxu1 }
 0x19e   :  { %vm959_vm10 = vcmp.gt.f32.partialorder %v935_v22, 0.0  ;;  %v983_v31 = vmul.f32 0.1, %v935_v22  ;;  %v894_v32 = vmul.f32 %v1475_v3, %v794_v28  ;;  %v937_v35 = vadd.f32 %v1483_v11, %v889_v27 }
 0x19f   :  { %v1006_v34 = vsel %vm958_vm9, %v934_v18, %v982_v26  ;;  %v941_v36 = vadd.f32 %v1487_v16, %v893_v25  ;;  %vm964_vm11 = vcmp.gt.f32.partialorder %v940_v29, 0.0  ;;  %vm960_vm12 = vcmp.gt.f32.partialorder %v936_v30, 0.0 }
 0x1a0   :  { %v984_v37 = vmul.f32 0.1, %v936_v30  ;;  %v1007_v38 = vsel %vm959_vm10, %v935_v22, %v983_v31  ;;  %1030 = vst [vmem:[%s1617_s4] sm:$0xff] %v1006_v34  ;;  %v942_v40 = vadd.f32 %v1487_v16, %v894_v32  ;;  %v747_v41 = vpop.f32.mrb[4].mxu0  ;;  %vm961_vm13 = vcmp.gt.f32.partialorder %v937_v35, 0.0 }
 0x1a1   :  { %1031 = vst [vmem:[%s1617_s4 + $0x8] sm:$0xff] %v1007_v38  ;;  %v985_v42 = vmul.f32 0.1, %v937_v35  ;;  %vm965_vm14 = vcmp.gt.f32.partialorder %v941_v36, 0.0  ;;  %v988_v43 = vmul.f32 0.1, %v940_v29  ;;  %v895_v49 = vmul.f32 %v1475_v3, %v796_v33 }
 0x1a2   :  { %v1008_v7 = vsel %vm960_vm12, %v936_v30, %v984_v37  ;;  %vm966_vm15 = vcmp.gt.f32.partialorder %v942_v40, 0.0  ;;  %v989_v44 = vmul.f32 0.1, %v941_v36  ;;  %v990_v46 = vmul.f32 0.1, %v942_v40  ;;  %v749_v47 = vpop.f32.mrb[5].mxu0 }
 0x1a3   :  { %1032 = vst [vmem:[%s1617_s4 + $0x10] sm:$0xff] %v1008_v7  ;;  %v1009_v4 = vsel %vm961_vm13, %v937_v35, %v985_v42  ;;  %v1012_v23 = vsel %vm964_vm11, %v940_v29, %v988_v43  ;;  %v898_v50 = vmul.f32 %v1479_v8, %v747_v41  ;;  %v800_v39 = vpop.f32.mrb[4].mxu1  ;;  %v751_v51 = vpop.f32.mrb[6].mxu0  ;;  %v899_v54 = vmul.f32 %v1479_v8, %v749_v47 }
 0x1a4   :  { %1033 = vst [vmem:[%s1617_s4 + $0x18] sm:$0xff] %v1009_v4  ;;  %v1013_v52 = vsel %vm965_vm14, %v941_v36, %v989_v44  ;;  %v1014_v5 = vsel %vm966_vm15, %v942_v40, %v990_v46  ;;  %1036 = vst [vmem:[%s1617_s4 + $0x30] sm:$0xff] %v1012_v23  ;;  %v900_v53 = vmul.f32 %v1479_v8, %v800_v39  ;;  %v802_v45 = vpop.f32.mrb[5].mxu1  ;;  %v753_v55 = vpop.f32.mrb[7].mxu0 }
 0x1a5   :  { %1037 = vst [vmem:[%s1617_s4 + $0x38] sm:$0xff] %v1013_v52  ;;  %1038 = vst [vmem:[%s1617_s4 + $0x40] sm:$0xff] %v1014_v5  ;;  %v943_v56 = vadd.f32 %v1487_v16, %v895_v49  ;;  %v901_v58 = vmul.f32 %v1479_v8, %v802_v45  ;;  %v904_v59 = vmul.f32 %v1481_v9, %v751_v51  ;;  %v804_v57 = vpop.f32.mrb[6].mxu1 }
 0x1a6   :  { %v905_v60 = vmul.f32 %v1481_v9, %v753_v55  ;;  %v906_v61 = vmul.f32 %v1481_v9, %v804_v57  ;;  %v806_v62 = vpop.f32.mrb[7].mxu1  ;;  %v946_v63 = vadd.f32 %v1507_v48, %v898_v50  ;;  %v947_v0 = vadd.f32 %v1507_v48, %v899_v54 }
 0x1a7   :  { %v948_v1 = vadd.f32 %v1507_v48, %v900_v53  ;;  %vm967_vm0 = vcmp.gt.f32.partialorder %v943_v56, 0.0  ;;  %v991_v2 = vmul.f32 0.1, %v943_v56  ;;  %v907_v10 = vmul.f32 %v1481_v9, %v806_v62 }
 0x1a8   :  { %v949_v12 = vadd.f32 %v1507_v48, %v901_v58  ;;  %vm970_vm1 = vcmp.gt.f32.partialorder %v946_v63, 0.0  ;;  %vm971_vm2 = vcmp.gt.f32.partialorder %v947_v0, 0.0  ;;  %v994_v14 = vmul.f32 0.1, %v946_v63 }
 0x1a9   :  { %vm972_vm3 = vcmp.gt.f32.partialorder %v948_v1, 0.0  ;;  %v1015_v15 = vsel %vm967_vm0, %v943_v56, %v991_v2  ;;  %v995_v17 = vmul.f32 0.1, %v947_v0  ;;  %v996_v18 = vmul.f32 0.1, %v948_v1 }
 0x1aa   :  { %vm973_vm4 = vcmp.gt.f32.partialorder %v949_v12, 0.0  ;;  %1039 = vst [vmem:[%s1617_s4 + $0x48] sm:$0xff] %v1015_v15  ;;  %v997_v19 = vmul.f32 0.1, %v949_v12  ;;  %v1018_v20 = vsel %vm970_vm1, %v946_v63, %v994_v14  ;;  %v952_v21 = vadd.f32 %v1540_v13, %v904_v59 }
 0x1ab   :  { %v953_v22 = vadd.f32 %v1540_v13, %v905_v60  ;;  %v1019_v24 = vsel %vm971_vm2, %v947_v0, %v995_v17  ;;  %v1020_v25 = vsel %vm972_vm3, %v948_v1, %v996_v18  ;;  %1042 = vst [vmem:[%s1617_s4 + $0x60] sm:$0xff] %v1018_v20  ;;  %v954_v26 = vadd.f32 %v1540_v13, %v906_v61 }
 0x1ac   :  { %v955_v27 = vadd.f32 %v1540_v13, %v907_v10  ;;  %v1021_v28 = vsel %vm973_vm4, %v949_v12, %v997_v19  ;;  %1043 = vst [vmem:[%s1617_s4 + $0x68] sm:$0xff] %v1019_v24  ;;  %1044 = vst [vmem:[%s1617_s4 + $0x70] sm:$0xff] %v1020_v25  ;;  %vm976_vm5 = vcmp.gt.f32.partialorder %v952_v21, 0.0  ;;  %v1000_v29 = vmul.f32 0.1, %v952_v21 }
 0x1ad   :  { %vm977_vm6 = vcmp.gt.f32.partialorder %v953_v22, 0.0  ;;  %1045 = vst [vmem:[%s1617_s4 + $0x78] sm:$0xff] %v1021_v28  ;;  %vm978_vm7 = vcmp.gt.f32.partialorder %v954_v26, 0.0  ;;  %v1001_v30 = vmul.f32 0.1, %v953_v22 }
 0x1ae   :  { %vm979_vm8 = vcmp.gt.f32.partialorder %v955_v27, 0.0  ;;  %v1002_v31 = vmul.f32 0.1, %v954_v26  ;;  %v1003_v32 = vmul.f32 0.1, %v955_v27  ;;  %v1024_v33 = vsel %vm976_vm5, %v952_v21, %v1000_v29 }
 0x1af   :  { %v1025_v34 = vsel %vm977_vm6, %v953_v22, %v1001_v30  ;;  %1048 = vst [vmem:[%s1617_s4 + $0x90] sm:$0xff] %v1024_v33 }
 0x1b0   :  { %v1026_v35 = vsel %vm978_vm7, %v954_v26, %v1002_v31  ;;  %v1027_v36 = vsel %vm979_vm8, %v955_v27, %v1003_v32  ;;  %1049 = vst [vmem:[%s1617_s4 + $0x98] sm:$0xff] %v1025_v34 }
 0x1b1   :  { %1050 = vst [vmem:[%s1617_s4 + $0xa0] sm:$0xff] %v1026_v35  ;;  %1051 = vst [vmem:[%s1617_s4 + $0xa8] sm:$0xff] %v1027_v36 }
 0x1bc   :  { %v843_v37 = vpop.f32.mrb[8].mxu0 }
 0x1bd   :  { %v890_v38 = vmul.f32 %v1477_v6, %v843_v37  ;;  %v845_v40 = vpop.f32.mrb[9].mxu0 }
 0x1be   :  { %v891_v41 = vmul.f32 %v1477_v6, %v845_v40  ;;  %v847_v42 = vpop.f32.mrb[10].mxu0  ;;  %v853_v7 = vpop.f32.mrb[8].mxu1 }
 0x1bf   :  { %v938_v43 = vadd.f32 %v1483_v11, %v890_v38  ;;  %v896_v44 = vmul.f32 %v1475_v3, %v847_v42  ;;  %v849_v46 = vpop.f32.mrb[11].mxu0  ;;  %v902_v4 = vmul.f32 %v1479_v8, %v853_v7  ;;  %v855_v23 = vpop.f32.mrb[9].mxu1 }
 0x1c0   :  { %v939_v47 = vadd.f32 %v1483_v11, %v891_v41  ;;  %v897_v49 = vmul.f32 %v1475_v3, %v849_v46  ;;  %v903_v6 = vmul.f32 %v1479_v8, %v855_v23  ;;  %v857_v51 = vpop.f32.mrb[10].mxu1 }
 0x1c1   :  { %vm962_vm9 = vcmp.gt.f32.partialorder %v938_v43, 0.0  ;;  %v986_v50 = vmul.f32 0.1, %v938_v43  ;;  %v944_v39 = vadd.f32 %v1487_v16, %v896_v44  ;;  %v950_v5 = vadd.f32 %v1507_v48, %v902_v4  ;;  %v859_v54 = vpop.f32.mrb[11].mxu1 }
 0x1c2   :  { %vm963_vm10 = vcmp.gt.f32.partialorder %v939_v47, 0.0  ;;  %v987_v52 = vmul.f32 0.1, %v939_v47  ;;  %v945_v53 = vadd.f32 %v1487_v16, %v897_v49  ;;  %v951_v55 = vadd.f32 %v1507_v48, %v903_v6 }
 0x1c3   :  { %v1010_v11 = vsel %vm962_vm9, %v938_v43, %v986_v50  ;;  %vm968_vm11 = vcmp.gt.f32.partialorder %v944_v39, 0.0  ;;  %v992_v45 = vmul.f32 0.1, %v944_v39  ;;  %vm974_vm12 = vcmp.gt.f32.partialorder %v950_v5, 0.0 }
 0x1c4   :  { %1034 = vst [vmem:[%s1617_s4 + $0x20] sm:$0xff] %v1010_v11  ;;  %v1011_v3 = vsel %vm963_vm10, %v939_v47, %v987_v52  ;;  %v998_v8 = vmul.f32 0.1, %v950_v5  ;;  %vm969_vm13 = vcmp.gt.f32.partialorder %v945_v53, 0.0  ;;  %vm975_vm14 = vcmp.gt.f32.partialorder %v951_v55, 0.0 }
 0x1c5   :  { %1035 = vst [vmem:[%s1617_s4 + $0x28] sm:$0xff] %v1011_v3  ;;  %v1016_v56 = vsel %vm968_vm11, %v944_v39, %v992_v45  ;;  %v999_v16 = vmul.f32 0.1, %v951_v55  ;;  %v993_v58 = vmul.f32 0.1, %v945_v53  ;;  %v908_v48 = vmul.f32 %v1481_v9, %v857_v51 }
 0x1c6   :  { %v1022_v59 = vsel %vm974_vm12, %v950_v5, %v998_v8  ;;  %1040 = vst [vmem:[%s1617_s4 + $0x50] sm:$0xff] %v1016_v56  ;;  %v909_v57 = vmul.f32 %v1481_v9, %v859_v54 }
 0x1c7   :  { %1046 = vst [vmem:[%s1617_s4 + $0x80] sm:$0xff] %v1022_v59  ;;  %v1023_v60 = vsel %vm975_vm14, %v951_v55, %v999_v16  ;;  %v1017_v61 = vsel %vm969_vm13, %v945_v53, %v993_v58  ;;  %v956_v62 = vadd.f32 %v1540_v13, %v908_v48 }
 0x1c8   :  { %1047 = vst [vmem:[%s1617_s4 + $0x88] sm:$0xff] %v1023_v60  ;;  %1041 = vst [vmem:[%s1617_s4 + $0x58] sm:$0xff] %v1017_v61  ;;  %v957_v63 = vadd.f32 %v1540_v13, %v909_v57 }
 0x1c9   :  { %vm980_vm15 = vcmp.gt.f32.partialorder %v956_v62, 0.0  ;;  %v1004_v9 = vmul.f32 0.1, %v956_v62 }
 0x1ca   :  { %vm981_vm0 = vcmp.gt.f32.partialorder %v957_v63, 0.0  ;;  %v1005_v0 = vmul.f32 0.1, %v957_v63 }
 0x1cb   :  { %v1028_v1 = vsel %vm980_vm15, %v956_v62, %v1004_v9 }
 0x1cc   :  { %v1029_v2 = vsel %vm981_vm0, %v957_v63, %v1005_v0  ;;  %1052 = vst [vmem:[%s1617_s4 + $0xb0] sm:$0xff] %v1028_v1 }
 0x1cd   :  { %1053 = vst [vmem:[%s1617_s4 + $0xb8] sm:$0xff] %v1029_v2 }

</bundles_post_ra>
